<compile_context>
chip_gen: v5e
topology: v5e:2x2
jax: 0.10.0
libtpu: 0.0.40
codegen_flags: <defaults>
</compile_context>

<pallas_src>
import functools

import jax
import jax.numpy as jnp
from jax import lax
from jax.experimental import pallas as pl
from jax.experimental.pallas import tpu as pltpu

LANE = 128
SUBLANE = 8
THRESHOLD = 0.6


def _colour_loss_kernel(x_ref, out_ref, acc_ref, *, tile_rows, rows_valid,
                        blocks_total, blocks_per_part, needs_mask):
    p = pl.program_id(0)   # partition (parallel / TC split)
    i = pl.program_id(1)   # block within partition (reduction axis)

    @pl.when(i == 0)
    def _():
        acc_ref[...] = jnp.zeros_like(acc_ref)

    # Hot path: one compare per element (in the input dtype, like PyTorch) and
    # one bool->int32 convert, then pure vreg adds.
    pred = x_ref[...] > THRESHOLD

    def accumulate(indicator):
        if tile_rows % SUBLANE == 0:
            # (tile_rows, 128) -> (G, 8, 128), reduce the leading dim:
            # VPU-only adds into the (8, 128) accumulator.
            acc_ref[...] += indicator.reshape(
                tile_rows // SUBLANE, SUBLANE, LANE).sum(axis=0)
        else:
            # Tiny-input fallback (single block, rows not a multiple of 8).
            acc_ref[...] += indicator.sum(axis=0, keepdims=True)

    if needs_mask:
        # Only the final real block and any clamped phantom block pay for the
        # iota mask; every steady-state block stays on the 2-op hot path.
        blk = p * blocks_per_part + i
        is_edge = blk >= blocks_total - 1

        @pl.when(jnp.logical_not(is_edge))
        def _():
            accumulate(pred.astype(jnp.int32))

        @pl.when(is_edge)
        def _():
            # Global row index from the UNCLAMPED block id so both the partial
            # tail block and any phantom (re-read) block are masked correctly.
            row = (blk * tile_rows
                   + lax.broadcasted_iota(jnp.int32, (tile_rows, LANE), 0))
            accumulate(
                jnp.logical_and(pred, row < rows_valid).astype(jnp.int32))
    else:
        accumulate(pred.astype(jnp.int32))

    @pl.when(i == pl.num_programs(1) - 1)
    def _():
        out_ref[...] = acc_ref[...]


def colour_loss(x, *, tile_rows=None, target_block_bytes=2 * 1024 * 1024,
                num_parts=2, use_core_parallel=False):
    """Computes 1 / sum(x > 0.6) with a Pallas TPU kernel."""
    n = x.size
    flat = x.reshape(-1)                       # free for contiguous input
    itemsize = flat.dtype.itemsize

    rows = n // LANE
    if n % LANE:
        # <=127-element lane tail: counted with a trivial wrapper-side sum
        # instead of materializing a padded copy of the whole input.
        tail_count = jnp.sum(flat[rows * LANE:] > THRESHOLD).astype(jnp.int32)
    else:
        tail_count = jnp.int32(0)

    if rows == 0:
        # Fewer than 128 elements: nothing for the streaming kernel to do.
        return 1.0 / tail_count

    mat = (flat[: rows * LANE] if n % LANE else flat).reshape(rows, LANE)

    # Byte-based block sizing (2 MiB default => 4096 f32 rows / 8192 bf16 rows),
    # capped at 8192 rows so double-buffered blocks fit v5e's 16 MiB scoped VMEM.
    if tile_rows is None:
        tile_rows = max(SUBLANE, target_block_bytes // (LANE * itemsize))
        tile_rows = min(tile_rows, 8192)
    tile_rows = min(int(tile_rows), rows)
    if tile_rows < rows:
        tile_rows = max(SUBLANE, tile_rows - tile_rows % SUBLANE)

    blocks_total = pl.cdiv(rows, tile_rows)

    # Split the stream across TensorCores (v7x: 2 TCs); no-op for small inputs.
    if blocks_total < num_parts:
        num_parts = 1
    blocks_per_part = pl.cdiv(blocks_total, num_parts)
    needs_mask = (num_parts * blocks_per_part * tile_rows) != rows

    acc_rows = SUBLANE if tile_rows % SUBLANE == 0 else 1

    kernel = functools.partial(
        _colour_loss_kernel,
        tile_rows=tile_rows,
        rows_valid=rows,
        blocks_total=blocks_total,
        blocks_per_part=blocks_per_part,
        needs_mask=needs_mask,
    )

    def in_map(p, i):
        # Clamp so a (rare) fully out-of-range phantom block re-reads the last
        # valid block instead of going OOB; its rows are masked in-kernel.
        blk = p * blocks_per_part + i
        return (jnp.minimum(blk, blocks_total - 1), 0)

    # TODO(synk): on v7x, verify whether "parallel" actually shards axis 0 across
    # both TensorCores; if not, call with use_core_parallel=True.
    if use_core_parallel:
        dim_sems = (pltpu.CORE_PARALLEL, pltpu.ARBITRARY)
    else:
        dim_sems = ("parallel", "arbitrary")

    partials = pl.pallas_call(
        kernel,
        out_shape=jax.ShapeDtypeStruct((num_parts * acc_rows, LANE), jnp.int32),
        grid_spec=pltpu.PrefetchScalarGridSpec(
            num_scalar_prefetch=0,
            grid=(num_parts, blocks_per_part),
            in_specs=[pl.BlockSpec((tile_rows, LANE), in_map)],
            out_specs=pl.BlockSpec((acc_rows, LANE), lambda p, i: (p, 0)),
            scratch_shapes=[pltpu.VMEM((acc_rows, LANE), jnp.int32)],
        ),
        compiler_params=pltpu.CompilerParams(
            dimension_semantics=dim_sems,
        ),
        cost_estimate=pl.CostEstimate(
            flops=2 * rows * LANE,
            transcendentals=0,
            bytes_accessed=rows * LANE * itemsize
                           + num_parts * acc_rows * LANE * 4,
        ),
    )(mat)

    # Tiny final combine (exact int32 count) + reciprocal.
    # Matches PyTorch 1 / y.sum() (inf when no element exceeds the threshold).
    count = jnp.sum(partials) + tail_count
    return 1.0 / count


if __name__ == "__main__":
    key = jax.random.PRNGKey(0)
    x = jax.random.uniform(key, (2, 4, 16, 16), dtype=jnp.float32)  # NCHW

    ref = 1.0 / jnp.sum(x > THRESHOLD)

    # Default (single large block) path.
    out = jax.block_until_ready(colour_loss(x))
    assert jnp.allclose(out, ref, rtol=1e-6, atol=0.0), (out, ref)

    # Multi-block / 2-partition path on the same input.
    out2 = jax.block_until_ready(colour_loss(x, tile_rows=8))
    assert jnp.allclose(out2, ref, rtol=1e-6, atol=0.0), (out2, ref)

    # Ragged size: wrapper-side lane-tail count + in-kernel row-tail masking.
    x3 = jax.random.uniform(jax.random.PRNGKey(1), (2, 3, 15, 17),
                            dtype=jnp.float32)
    ref3 = 1.0 / jnp.sum(x3 > THRESHOLD)
    out3 = jax.block_until_ready(colour_loss(x3, tile_rows=8))
    assert jnp.allclose(out3, ref3, rtol=1e-6, atol=0.0), (out3, ref3)
    out4 = jax.block_until_ready(colour_loss(x3))   # non-multiple-of-8 acc path
    assert jnp.allclose(out4, ref3, rtol=1e-6, atol=0.0), (out4, ref3)

    # Partial last block + clamped phantom block path.
    x5 = jax.random.uniform(jax.random.PRNGKey(2), (3, 3, 33, 33),
                            dtype=jnp.float32)
    ref5 = 1.0 / jnp.sum(x5 > THRESHOLD)
    out5 = jax.block_until_ready(colour_loss(x5, tile_rows=32))
    assert jnp.allclose(out5, ref5, rtol=1e-6, atol=0.0), (out5, ref5)

    print("KERNEL_OK")
</pallas_src>

<mosaic_0001>
module attributes {stable_mosaic.version = 11 : i64} {
  func.func @_colour_loss_kernel(%arg0: i32, %arg1: i32, %arg2: memref<16x128xf32, #tpu.memory_space<vmem>>, %arg3: memref<8x128xi32, #tpu.memory_space<vmem>>, %arg4: memref<8x128xi32, #tpu.memory_space<vmem>>) attributes {dimension_semantics = [#tpu.dimension_semantics<parallel>, #tpu.dimension_semantics<arbitrary>], iteration_bounds = array<i64: 1, 1>, scalar_prefetch = 0 : i64, scratch_operands = 1 : i64, tpu.core_type = #tpu.core_type<tc>, window_params = [{transform_indices = @transform_0, window_bounds = array<i64: 16, 128>}, {transform_indices = @transform_1, window_bounds = array<i64: 8, 128>}]} {
    %c0_i32 = arith.constant 0 : i32
    %0 = arith.cmpi eq, %arg1, %c0_i32 : i32
    %1 = arith.extui %0 : i1 to i32
    %c0_i32_0 = arith.constant 0 : i32
    %2 = arith.cmpi ne, %1, %c0_i32_0 : i32
    scf.if %2 {
      %c0_i32_9 = arith.constant 0 : i32
      %15 = vector.broadcast %c0_i32_9 : i32 to vector<8x128xi32>
      %c0_10 = arith.constant 0 : index
      %c0_11 = arith.constant 0 : index
      %16 = vector.load %arg4[%c0_10, %c0_11] : memref<8x128xi32, #tpu.memory_space<vmem>>, vector<8x128xi32>
      tpu.vector_store %arg4[%c0_10, %c0_11], %15 {strides = array<i32>} : memref<8x128xi32, #tpu.memory_space<vmem>>, vector<8x128xi32>,
    } else {
    }
    %c0 = arith.constant 0 : index
    %c0_1 = arith.constant 0 : index
    %3 = vector.load %arg2[%c0, %c0_1] : memref<16x128xf32, #tpu.memory_space<vmem>>, vector<16x128xf32>
    %cst = arith.constant 6.000000e-01 : f32
    %4 = vector.broadcast %cst : f32 to vector<16x128xf32>
    %5 = arith.cmpf ogt, %3, %4 : vector<16x128xf32>
    %6 = arith.extui %5 : vector<16x128xi1> to vector<16x128xi32>
    %c0_2 = arith.constant 0 : index
    %c0_3 = arith.constant 0 : index
    %7 = vector.load %arg4[%c0_2, %c0_3] : memref<8x128xi32, #tpu.memory_space<vmem>>, vector<8x128xi32>
    %8 = vector.shape_cast %6 : vector<16x128xi32> to vector<2x8x128xi32>
    %cst_4 = arith.constant dense<0> : vector<8x128xi32>
    %9 = vector.multi_reduction <add>, %8, %cst_4 [0] : vector<2x8x128xi32> to vector<8x128xi32>
    %10 = arith.addi %7, %9 : vector<8x128xi32>
    %c0_5 = arith.constant 0 : index
    %c0_6 = arith.constant 0 : index
    %11 = vector.load %arg4[%c0_5, %c0_6] : memref<8x128xi32, #tpu.memory_space<vmem>>, vector<8x128xi32>
    tpu.vector_store %arg4[%c0_5, %c0_6], %10 {strides = array<i32>} : memref<8x128xi32, #tpu.memory_space<vmem>>, vector<8x128xi32>,
    %c0_i32_7 = arith.constant 0 : i32
    %12 = arith.cmpi eq, %arg1, %c0_i32_7 : i32
    %13 = arith.extui %12 : i1 to i32
    %c0_i32_8 = arith.constant 0 : i32
    %14 = arith.cmpi ne, %13, %c0_i32_8 : i32
    scf.if %14 {
      %c0_9 = arith.constant 0 : index
      %c0_10 = arith.constant 0 : index
      %15 = vector.load %arg4[%c0_9, %c0_10] : memref<8x128xi32, #tpu.memory_space<vmem>>, vector<8x128xi32>
      %c0_11 = arith.constant 0 : index
      %c0_12 = arith.constant 0 : index
      %16 = vector.load %arg3[%c0_11, %c0_12] : memref<8x128xi32, #tpu.memory_space<vmem>>, vector<8x128xi32>
      tpu.vector_store %arg3[%c0_11, %c0_12], %15 {strides = array<i32>} : memref<8x128xi32, #tpu.memory_space<vmem>>, vector<8x128xi32>,
    } else {
    }
    return
  }
  func.func @transform_0(%arg0: i32, %arg1: i32) -> (i32, i32) {
    %c1_i32 = arith.constant 1 : i32
    %0 = arith.muli %arg0, %c1_i32 : i32
    %1 = arith.addi %0, %arg1 : i32
    %c0_i32 = arith.constant 0 : i32
    %2 = arith.minsi %1, %c0_i32 : i32
    %c0_i32_0 = arith.constant 0 : i32
    %c0_i32_1 = arith.constant 0 : i32
    return %2, %c0_i32_0 : i32, i32
  }
  func.func @transform_1(%arg0: i32, %arg1: i32) -> (i32, i32) {
    %c0_i32 = arith.constant 0 : i32
    %c0_i32_0 = arith.constant 0 : i32
    return %arg0, %c0_i32 : i32, i32
  }
}

</mosaic_0001>

<bundles_post_ra>
// kernel: tpu_custom_call.1
= control target key start
LH: loop header
LB: loop body
LE: loop exit
PB: predicated region body
PF: predicated region fallthrough
CT: control target
= control target key end

     0   :  { %6 = vsyncpa [#allocation4], 0  ;;  %s152_s0 = inlined_call_operand.hbm [shape: f32[16,128], index: 0, kind: input, shape index: {}]   ;;  %s153_s1 = inlined_call_operand.hbm [shape: s32[8,128], index: 1, kind: output, shape index: {}]  }
   0x1   :  { %7 = vsyncpa [#allocation5], 0  ;;  %s18_s8 = sshll.u32 %s152_s0, 4  ;;  %s131_s9 = smov [#allocation3]   ;;  %s19_s8 = int_to_ptr.hbm [resolvable:$true] %s18_s8 }
   0x2   :  { %s20_s10 = sshll.u32 %s131_s9, 4  ;;  %s132_s11 = smov 128   ;;  %s21_s10 = int_to_ptr.vmem [resolvable:$true] %s20_s10 }
   0x3   :  { %s133_s12 = smov 8  }
   0x4   :  { %26 = dma.hbm_to_vmem [thread:$0]  %s19_s8, 256, %s21_s10, [#allocation4], %s132_s11, %s132_s11, %s133_s12  }
   0x5   :  { %127 = dma.done.wait [#allocation4], 256  }
   0x6   :  { %128 = vsyncadd [#allocation4], 4294967040  ;;  %v40_v0 = vld [vmem:[#allocation3] sm:$0xff]  ;;  %v41_v1 = vld [vmem:[#allocation3 + $0x8] sm:$0xff]  ;;  %s134_s13 = smov [#allocation6]   ;;  %s62_s17 = sshll.u32 %s153_s1, 4  ;;  %s63_s17 = int_to_ptr.hbm [resolvable:$true] %s62_s17 }
   0x7   :  { %s60_s14 = sshll.u32 %s134_s13, 4  ;;  %vm42_vm0 = vcmp.gt.f32.partialorder %v40_v0, 0.6  ;;  %vm43_vm1 = vcmp.gt.f32.partialorder %v41_v1, 0.6  ;;  %v135_v2 = vmov 0   ;;  %s61_s14 = int_to_ptr.vmem [resolvable:$true] %s60_s14 }
   0x8   :  { %v44_v3 = vsel %vm42_vm0, 1, %v135_v2  ;;  %v45_v4 = vsel %vm43_vm1, 1, %v135_v2 }
   0x9   :  { %v47_v5 = vadd.s32 %v45_v4, %v44_v3 }
   0xb   :  { %54 = vst [vmem:[#allocation6] sm:$0xff] %v47_v5 }
   0xc   :  { %65 = dma.vmem_to_hbm [thread:$0]  %s61_s14, 128, %s63_s17, [#allocation5]  }
   0xd   :  { %129 = dma.done.wait [#allocation5], 128  }
   0xe   :  { %130 = vsyncadd [#allocation5], 4294967168 }
   0xf   :  { %70 = vsyncpa [#allocation4], 1 }
  0x10   :  { %71 = vsyncpa [#allocation5], 1 }

</bundles_post_ra>
